<compile_context>
chip_gen: v7x
topology: tpu7x:2x2x1
jax: 0.10.0
libtpu: 0.0.40
codegen_flags: <defaults>
</compile_context>

<pallas_src>
import math

import jax
import jax.numpy as jnp
import numpy as np
from jax.experimental import pallas as pl
from jax.experimental.pallas import tpu as pltpu


def _decoder_kernel(mix_ref, mask_ref, w_ref, out_ref, tail_ref, carry_ref):
    # mix_ref, mask_ref: (1, N, Kt)  channel-first input block, frames on lanes
    # w_ref:             (L, N)      native nn.Linear weight (no transpose)
    # out_ref:           (1, H, Kt)  OLA sub-frames for this K tile, H = L // 2
    # tail_ref:          (1, H, 1)   last second-half frame of this chunk
    # carry_ref:         (H, 1)      second half of the previous tile's last frame
    #
    # Grid = (B, chunks, KT).  NOTE: the K-tile axis (2) must remain the
    # innermost sequential ("arbitrary") axis — the seam carry below relies on
    # t iterating in order within each (batch, chunk).
    t = pl.program_id(2)

    @pl.when(t == 0)
    def _():
        carry_ref[...] = jnp.zeros_like(carry_ref)

    # Mask-mul + basis projection in the input dtype (bf16 halves HBM reads),
    # MXU accumulation in f32.  Frame axis K stays on the 128-lane axis.
    src = mix_ref[0] * mask_ref[0]                                      # [N, Kt]
    frames = jnp.dot(w_ref[...], src, preferred_element_type=jnp.float32)  # [L, Kt]

    h = out_ref.shape[1]                                                # H = L // 2
    kt = out_ref.shape[2]
    first = frames[:h, :]                                               # [H, Kt]
    second = frames[h:, :]                                              # [H, Kt]

    # Overlap-and-add with hop = H:  out[:, k] = first[:, k] + second[:, k-1]
    if kt % 128 == 0:
        # Single aligned lane-dense store: shift `second` right by one frame on
        # the XLU and blend the cross-tile carry into lane 0.
        shifted = pltpu.roll(second, shift=1, axis=1)                   # [:, k] <- second[:, k-1]
        lane = jax.lax.broadcasted_iota(jnp.int32, (h, kt), 1)
        shifted = jnp.where(lane == 0,
                            jnp.broadcast_to(carry_ref[...], (h, kt)),
                            shifted)
        out_ref[0] = (first + shifted).astype(out_ref.dtype)
    else:
        # Small single-tile fallback (K < 128): two slice stores.
        out_ref[0, :, 0:1] = (first[:, 0:1] + carry_ref[...]).astype(out_ref.dtype)
        if kt > 1:
            out_ref[0, :, 1:] = (first[:, 1:] + second[:, : kt - 1]).astype(out_ref.dtype)

    # Seam carried to the next K tile of this (batch, chunk).
    carry_ref[...] = second[:, kt - 1 : kt]

    @pl.when(t == pl.num_programs(2) - 1)
    def _():
        tail_ref[0] = second[:, kt - 1 : kt].astype(tail_ref.dtype)


def _vmem_plan():
    """(vmem_limit_bytes, per-tile VMEM budget) derived from the chip generation."""
    phys = 64 << 20                      # conservative default: v7x per-TC VMEM
    try:
        cap = getattr(pltpu.get_tpu_info(), "vmem_capacity_bytes", None)
        if cap:
            phys = int(cap)
    except Exception:
        pass
    if phys >= (128 << 20):              # v5e / v6e: 128 MiB physical VMEM
        return 96 << 20, 64 << 20
    return 48 << 20, 26 << 20            # v7x: 64 MiB per TC — smaller tiles


def _pick_k_tile(K_chunk, N, L, in_bytes, w_bytes, budget_bytes):
    """Largest lane-aligned K tile whose *full* VMEM footprint fits the budget.

    Accounts for the double-buffered inputs, the materialized src/frames
    temporaries, the output buffers and the double-buffered weight block.
    """
    H = L // 2

    def need(kt):
        inputs = 2 * 2 * N * kt * in_bytes           # mix + mask, double-buffered
        outputs = 2 * H * kt * 4 + 2 * H * 4         # main + tail, double-buffered
        weight = 2 * L * N * w_bytes                 # constant-index, still 2 buffers
        temps = (N + 2 * L) * kt * 4                 # src, frames, OLA temporaries (f32)
        return inputs + outputs + weight + temps

    if K_chunk % 128 != 0:
        return K_chunk                               # small single-tile path (K < 128)
    best, kt = 128, 128
    while kt <= K_chunk:
        if K_chunk % kt == 0 and need(kt) <= budget_bytes:
            best = kt
        kt += 128
    return best


def decoder_forward(mixture_w, est_mask, weight_ln, L, k_tile=None, k_chunks=None):
    """Decoder forward.

    mixture_w, est_mask: [B, N, K] (float32 or bfloat16 — bf16 halves the
    dominant HBM read traffic of this bandwidth-bound kernel).
    weight_ln: [L, N], native nn.Linear(N, L, bias=False) weight layout.
    Returns [B, (K - 1) * L // 2 + L] float32.
    """
    B, N, K = mixture_w.shape
    assert L % 2 == 0
    H = L // 2
    assert weight_ln.shape == (L, N)

    dtype = mixture_w.dtype
    est_mask = est_mask.astype(dtype)
    weight = weight_ln.astype(dtype)                 # tiny; feed the MXU in the input dtype
    in_bytes = jnp.dtype(dtype).itemsize
    w_bytes = jnp.dtype(weight.dtype).itemsize

    vmem_limit, budget = _vmem_plan()

    # Split the K axis into independent parallel chunks (seams stitched in the
    # wrapper) so both v7x TensorCores stay busy when B == 1.
    if k_chunks is None:
        k_chunks = 2 if (B == 1 and K >= 256) else 1
    assert k_chunks >= 1
    if k_chunks > 1:
        assert K >= 128 * k_chunks

    # Lane-align the frame axis: ragged K is zero-padded (padded frames are all
    # zero and contribute nothing to the OLA; the final sub-frame then lands in
    # column K of the main output, so no wrapper concatenate is needed).
    if K >= 128:
        align = 128 * k_chunks
        K_pad = ((K + align - 1) // align) * align
    else:
        K_pad = K
    Kc = K_pad // k_chunks

    Kt = _pick_k_tile(Kc, N, L, in_bytes, w_bytes, budget) if k_tile is None else k_tile
    assert Kc % Kt == 0
    KT = Kc // Kt

    if K_pad > K:
        pad = [(0, 0), (0, 0), (0, K_pad - K)]
        mixture_w = jnp.pad(mixture_w, pad)
        est_mask = jnp.pad(est_mask, pad)

    cost = pl.CostEstimate(
        flops=2 * B * L * N * K_pad,
        transcendentals=0,
        bytes_accessed=2 * B * N * K_pad * in_bytes
        + 4 * B * H * (K_pad + k_chunks)
        + L * N * w_bytes,
    )

    out_main, tails = pl.pallas_call(
        _decoder_kernel,
        out_shape=(
            jax.ShapeDtypeStruct((B, H, K_pad), jnp.float32),
            jax.ShapeDtypeStruct((B, H, k_chunks), jnp.float32),
        ),
        grid_spec=pltpu.PrefetchScalarGridSpec(
            num_scalar_prefetch=0,
            grid=(B, k_chunks, KT),
            in_specs=[
                pl.BlockSpec((1, N, Kt), lambda b, c, t: (b, 0, c * KT + t)),
                pl.BlockSpec((1, N, Kt), lambda b, c, t: (b, 0, c * KT + t)),
                # Constant-index weight block: DMA'd only once.
                # TODO(synk): pipeline_mode=pl.Buffered(1) would reclaim one
                # (L, N) VMEM buffer once that path is verified on this pipeline.
                pl.BlockSpec((L, N), lambda b, c, t: (0, 0)),
            ],
            out_specs=(
                pl.BlockSpec((1, H, Kt), lambda b, c, t: (b, 0, c * KT + t)),
                pl.BlockSpec((1, H, 1), lambda b, c, t: (b, 0, c)),
            ),
            scratch_shapes=[pltpu.VMEM((H, 1), jnp.float32)],
        ),
        compiler_params=pltpu.CompilerParams(
            # K-tile axis MUST stay innermost + "arbitrary" (seam carry).
            dimension_semantics=("parallel", "parallel", "arbitrary"),
            vmem_limit_bytes=vmem_limit,
        ),
        cost_estimate=cost,
    )(mixture_w, est_mask, weight)

    # Stitch the one-frame seam at each parallel-chunk boundary (tiny update).
    full = out_main
    for c in range(1, k_chunks):
        full = full.at[:, :, c * Kc].add(tails[:, :, c - 1])

    if K_pad > K:
        sub = full[:, :, : K + 1]                    # tail already sits in column K
    else:
        sub = jnp.concatenate([full, tails[:, :, k_chunks - 1 : k_chunks]], axis=2)

    # Lane-dense kernel stores; cheap layout fix-up stays in the wrapper.
    T = (K - 1) * H + L
    return jnp.transpose(sub, (0, 2, 1)).reshape(B, T)


def _reference(mixture_w, est_mask, weight_ln, L):
    """Pure NumPy reference mirroring the PyTorch code."""
    est = np.asarray(mixture_w, dtype=np.float32) * np.asarray(est_mask, dtype=np.float32)
    est = np.transpose(est, (0, 2, 1))                         # [B, K, N]
    frames = est @ np.asarray(weight_ln, dtype=np.float32).T   # [B, K, L]
    B, K, _ = frames.shape
    H = L // 2
    T = (K - 1) * H + L
    out = np.zeros((B, K + 1, H), dtype=np.float32)
    out[:, :K, :] += frames[:, :, :H]
    out[:, 1:, :] += frames[:, :, H:]
    return out.reshape(B, T)


def _run_case(B, N, K, L, k_tile=None, k_chunks=None, dtype=jnp.float32,
              rtol=1e-5, atol=1e-5):
    key = jax.random.PRNGKey(0)
    k1, k2, k3 = jax.random.split(key, 3)
    mixture_w = jax.random.normal(k1, (B, N, K), dtype=jnp.float32)
    est_mask = jax.nn.sigmoid(jax.random.normal(k2, (B, N, K), dtype=jnp.float32))
    bound = 1.0 / math.sqrt(N)   # nn.Linear(N, L, bias=False).weight is [L, N]
    weight_ln = jax.random.uniform(k3, (L, N), minval=-bound, maxval=bound,
                                   dtype=jnp.float32)

    mix_in = mixture_w.astype(dtype)
    mask_in = est_mask.astype(dtype)

    out = decoder_forward(mix_in, mask_in, weight_ln, L, k_tile=k_tile,
                          k_chunks=k_chunks)
    out = jax.block_until_ready(out)

    # Reference uses the (possibly bf16-rounded) inputs, so only the in-kernel
    # low-precision mask-mul/matmul rounding remains as error.
    ref = _reference(mix_in.astype(jnp.float32), mask_in.astype(jnp.float32),
                     weight_ln, L)
    assert out.shape == ref.shape == (B, (K - 1) * (L // 2) + L)
    np.testing.assert_allclose(np.asarray(out), ref, rtol=rtol, atol=atol)


if __name__ == "__main__":
    # Small shapes consistent with the module: N=64 basis channels, L=16 frame
    # length (hop = 8).
    _run_case(B=2, N=64, K=8, L=16)                        # single small tile (slice path)
    _run_case(B=2, N=64, K=256, L=16, k_tile=128)          # roll-store path + seam carry
    _run_case(B=2, N=64, K=200, L=16)                      # ragged K -> zero-pad, tail in col K
    _run_case(B=1, N=64, K=256, L=16)                      # auto K-chunking when B == 1
    _run_case(B=2, N=64, K=256, L=16, dtype=jnp.bfloat16,  # bf16 input (bandwidth) path
              rtol=2e-2, atol=2e-2)
    print("KERNEL_OK")
</pallas_src>

<mosaic_0001>
module attributes {stable_mosaic.version = 11 : i64} {
  func.func @_decoder_kernel(%arg0: i32, %arg1: i32, %arg2: i32, %arg3: memref<1x64x8xf32, #tpu.memory_space<vmem>>, %arg4: memref<1x64x8xf32, #tpu.memory_space<vmem>>, %arg5: memref<16x64xf32, #tpu.memory_space<vmem>>, %arg6: memref<1x8x8xf32, #tpu.memory_space<vmem>>, %arg7: memref<1x8x1xf32, #tpu.memory_space<vmem>>, %arg8: memref<8x1xf32, #tpu.memory_space<vmem>>) attributes {dimension_semantics = [#tpu.dimension_semantics<parallel>, #tpu.dimension_semantics<parallel>, #tpu.dimension_semantics<arbitrary>], iteration_bounds = array<i64: 2, 1, 1>, scalar_prefetch = 0 : i64, scratch_operands = 1 : i64, tpu.core_type = #tpu.core_type<tc>, window_params = [{transform_indices = @transform_0, window_bounds = array<i64: 1, 64, 8>}, {transform_indices = @transform_1, window_bounds = array<i64: 1, 64, 8>}, {pipeline_mode = #tpu.pipeline_mode<synchronous>, transform_indices = @transform_2, window_bounds = array<i64: 16, 64>}, {transform_indices = @transform_3, window_bounds = array<i64: 1, 8, 8>}, {transform_indices = @transform_4, window_bounds = array<i64: 1, 8, 1>}]} {
    %c0_i32 = arith.constant 0 : i32
    %0 = arith.cmpi eq, %arg2, %c0_i32 : i32
    %1 = arith.extui %0 : i1 to i32
    %c0_i32_0 = arith.constant 0 : i32
    %2 = arith.cmpi ne, %1, %c0_i32_0 : i32
    scf.if %2 {
      %cst_19 = arith.constant 0.000000e+00 : f32
      %29 = vector.broadcast %cst_19 : f32 to vector<8x1xf32>
      %c0_20 = arith.constant 0 : index
      %c0_21 = arith.constant 0 : index
      %30 = vector.load %arg8[%c0_20, %c0_21] : memref<8x1xf32, #tpu.memory_space<vmem>>, vector<8x1xf32>
      tpu.vector_store %arg8[%c0_20, %c0_21], %29 {strides = array<i32>} : memref<8x1xf32, #tpu.memory_space<vmem>>, vector<8x1xf32>,
    } else {
    }
    %c0 = arith.constant 0 : index
    %c0_1 = arith.constant 0 : index
    %c0_2 = arith.constant 0 : index
    %3 = vector.load %arg3[%c0, %c0_1, %c0_2] : memref<1x64x8xf32, #tpu.memory_space<vmem>>, vector<1x64x8xf32>
    %4 = vector.shape_cast %3 : vector<1x64x8xf32> to vector<64x8xf32>
    %c0_3 = arith.constant 0 : index
    %c0_4 = arith.constant 0 : index
    %c0_5 = arith.constant 0 : index
    %5 = vector.load %arg4[%c0_3, %c0_4, %c0_5] : memref<1x64x8xf32, #tpu.memory_space<vmem>>, vector<1x64x8xf32>
    %6 = vector.shape_cast %5 : vector<1x64x8xf32> to vector<64x8xf32>
    %7 = arith.mulf %4, %6 : vector<64x8xf32>
    %c0_6 = arith.constant 0 : index
    %c0_7 = arith.constant 0 : index
    %8 = vector.load %arg5[%c0_6, %c0_7] : memref<16x64xf32, #tpu.memory_space<vmem>>, vector<16x64xf32>
    %cst = arith.constant dense<0.000000e+00> : vector<16x8xf32>
    %9 = tpu.matmul %8, %7, %cst {dimension_numbers = #tpu.dot_dimension_numbers<[1], [0], [0], [1], [0, 0, 1, 1], [], []>} : vector<16x64xf32>, vector<64x8xf32>, vector<16x8xf32> -> vector<16x8xf32>
    %10 = vector.extract_strided_slice %9 {offsets = [0, 0], sizes = [8, 8], strides = [1, 1]} : vector<16x8xf32> to vector<8x8xf32>
    %11 = vector.extract_strided_slice %9 {offsets = [8, 0], sizes = [8, 8], strides = [1, 1]} : vector<16x8xf32> to vector<8x8xf32>
    %12 = vector.extract_strided_slice %10 {offsets = [0, 0], sizes = [8, 1], strides = [1, 1]} : vector<8x8xf32> to vector<8x1xf32>
    %c0_8 = arith.constant 0 : index
    %c0_9 = arith.constant 0 : index
    %13 = vector.load %arg8[%c0_8, %c0_9] : memref<8x1xf32, #tpu.memory_space<vmem>>, vector<8x1xf32>
    %14 = arith.addf %12, %13 : vector<8x1xf32>
    %c0_10 = arith.constant 0 : index
    %c0_11 = arith.constant 0 : index
    %c0_12 = arith.constant 0 : index
    %15 = vector.load %arg6[%c0_10, %c0_11, %c0_12] : memref<1x8x8xf32, #tpu.memory_space<vmem>>, vector<1x8x1xf32>
    %16 = vector.shape_cast %15 : vector<1x8x1xf32> to vector<8x1xf32>
    %17 = vector.shape_cast %14 : vector<8x1xf32> to vector<1x8x1xf32>
    tpu.vector_store %arg6[%c0_10, %c0_11, %c0_12], %17 {strides = array<i32>} : memref<1x8x8xf32, #tpu.memory_space<vmem>>, vector<1x8x1xf32>,
    %18 = vector.extract_strided_slice %10 {offsets = [0, 1], sizes = [8, 7], strides = [1, 1]} : vector<8x8xf32> to vector<8x7xf32>
    %19 = vector.extract_strided_slice %11 {offsets = [0, 0], sizes = [8, 7], strides = [1, 1]} : vector<8x8xf32> to vector<8x7xf32>
    %20 = arith.addf %18, %19 : vector<8x7xf32>
    %c0_13 = arith.constant 0 : index
    %c0_14 = arith.constant 0 : index
    %c1 = arith.constant 1 : index
    %21 = vector.load %arg6[%c0_13, %c0_14, %c1] : memref<1x8x8xf32, #tpu.memory_space<vmem>>, vector<1x8x7xf32>
    %22 = vector.shape_cast %21 : vector<1x8x7xf32> to vector<8x7xf32>
    %23 = vector.shape_cast %20 : vector<8x7xf32> to vector<1x8x7xf32>
    tpu.vector_store %arg6[%c0_13, %c0_14, %c1], %23 {strides = array<i32>} : memref<1x8x8xf32, #tpu.memory_space<vmem>>, vector<1x8x7xf32>,
    %24 = vector.extract_strided_slice %11 {offsets = [0, 7], sizes = [8, 1], strides = [1, 1]} : vector<8x8xf32> to vector<8x1xf32>
    %c0_15 = arith.constant 0 : index
    %c0_16 = arith.constant 0 : index
    %25 = vector.load %arg8[%c0_15, %c0_16] : memref<8x1xf32, #tpu.memory_space<vmem>>, vector<8x1xf32>
    tpu.vector_store %arg8[%c0_15, %c0_16], %24 {strides = array<i32>} : memref<8x1xf32, #tpu.memory_space<vmem>>, vector<8x1xf32>,
    %c0_i32_17 = arith.constant 0 : i32
    %26 = arith.cmpi eq, %arg2, %c0_i32_17 : i32
    %27 = arith.extui %26 : i1 to i32
    %c0_i32_18 = arith.constant 0 : i32
    %28 = arith.cmpi ne, %27, %c0_i32_18 : i32
    scf.if %28 {
      %29 = vector.extract_strided_slice %11 {offsets = [0, 7], sizes = [8, 1], strides = [1, 1]} : vector<8x8xf32> to vector<8x1xf32>
      %c0_19 = arith.constant 0 : index
      %c0_20 = arith.constant 0 : index
      %c0_21 = arith.constant 0 : index
      %30 = vector.load %arg7[%c0_19, %c0_20, %c0_21] : memref<1x8x1xf32, #tpu.memory_space<vmem>>, vector<1x8x1xf32>
      %31 = vector.shape_cast %30 : vector<1x8x1xf32> to vector<8x1xf32>
      %32 = vector.shape_cast %29 : vector<8x1xf32> to vector<1x8x1xf32>
      tpu.vector_store %arg7[%c0_19, %c0_20, %c0_21], %32 {strides = array<i32>} : memref<1x8x1xf32, #tpu.memory_space<vmem>>, vector<1x8x1xf32>,
    } else {
    }
    return
  }
  func.func @transform_0(%arg0: i32, %arg1: i32, %arg2: i32) -> (i32, i32, i32) {
    %c1_i32 = arith.constant 1 : i32
    %0 = arith.muli %arg1, %c1_i32 : i32
    %1 = arith.addi %0, %arg2 : i32
    %c0_i32 = arith.constant 0 : i32
    %c0_i32_0 = arith.constant 0 : i32
    return %arg0, %c0_i32, %1 : i32, i32, i32
  }
  func.func @transform_1(%arg0: i32, %arg1: i32, %arg2: i32) -> (i32, i32, i32) {
    %c1_i32 = arith.constant 1 : i32
    %0 = arith.muli %arg1, %c1_i32 : i32
    %1 = arith.addi %0, %arg2 : i32
    %c0_i32 = arith.constant 0 : i32
    %c0_i32_0 = arith.constant 0 : i32
    return %arg0, %c0_i32, %1 : i32, i32, i32
  }
  func.func @transform_2(%arg0: i32, %arg1: i32, %arg2: i32) -> (i32, i32) {
    %c0_i32 = arith.constant 0 : i32
    %c0_i32_0 = arith.constant 0 : i32
    %c0_i32_1 = arith.constant 0 : i32
    return %c0_i32, %c0_i32_0 : i32, i32
  }
  func.func @transform_3(%arg0: i32, %arg1: i32, %arg2: i32) -> (i32, i32, i32) {
    %c1_i32 = arith.constant 1 : i32
    %0 = arith.muli %arg1, %c1_i32 : i32
    %1 = arith.addi %0, %arg2 : i32
    %c0_i32 = arith.constant 0 : i32
    %c0_i32_0 = arith.constant 0 : i32
    return %arg0, %c0_i32, %1 : i32, i32, i32
  }
  func.func @transform_4(%arg0: i32, %arg1: i32, %arg2: i32) -> (i32, i32, i32) {
    %c0_i32 = arith.constant 0 : i32
    %c0_i32_0 = arith.constant 0 : i32
    return %arg0, %c0_i32, %arg1 : i32, i32, i32
  }
}

</mosaic_0001>

<bundles_post_ra>
// kernel: tpu_custom_call.1
= control target key start
LH: loop header
LB: loop body
LE: loop exit
PB: predicated region body
PF: predicated region fallthrough
CT: control target
= control target key end

     0   :  { %10 = vsyncpa [#allocation4], 0  ;;  %s949_s0 = inlined_call_operand.vmem [shape: f32[2,64,8], index: 0, kind: input, shape index: {}]   ;;  %s950_s1 = inlined_call_operand.vmem [shape: f32[2,64,8], index: 1, kind: input, shape index: {}]   ;;  %s951_s2 = inlined_call_operand.vmem [shape: f32[16,64], index: 2, kind: input, shape index: {}]   ;;  %s952_s3 = inlined_call_operand.hbm [shape: f32[2,8,8], index: 3, kind: output, shape index: {0}]   ;;  %s953_s4 = inlined_call_operand.vmem [shape: f32[2,8,1], index: 4, kind: output, shape index: {1}]  }
   0x1   :  { %12 = vsyncpa [#allocation4 + $0x1], 0  ;;  %s812_s15 = smov 0   ;;  %s814_s16 = smov 0  }
   0x2   :  { %s816_s17 = smov 0   ;;  %s818_s18 = smov 0  }
   0x3   :  { %s820_s19 = smov 0   ;;  %s822_s20 = smov 0  }
   0x4 LB: > { %s581_s21 = sadd.s32 4294967295, %s781_s20   ;;  %s582_s22 = sadd.s32 4294967294, %s781_s20   ;;  %s781_s20 = sphi %s822_s20, %s18_s20   ;;  %s777_s19 = sphi %s820_s19, %s960_s19   ;;  %s773_s18 = sphi %s818_s18, %s959_s18   ;;  %s769_s17 = sphi %s816_s17, %s958_s17   ;;  %s765_s16 = sphi %s814_s16, %s957_s16   ;;  %s761_s15 = sphi %s812_s15, %s956_s15  }
   0x5   : > { %s37_s23 = sadd.s32 1, %s777_s19  ;;  %s129_s24 = sadd.s32 1, %s769_s17 }
   0x6   : > { %p39_p0 = scmp.ge.s32.totalorder %s37_s23, 2  ;;  %p139_p1 = scmp.ne.s32.totalorder %s769_s17, %s765_s16 }
   0x7   : > { %p140_p2 = scmp.eq.s32.totalorder %s581_s21, 1  ;;  %p145_p3 = scmp.ne.s32.totalorder %s765_s16, %s761_s15 }
   0x8   : > { %s962_s23 = smov (%p39_p0, %s37_s23), 0  ;;  %p146_p5 = scmp.eq.s32.totalorder %s582_s22, 1 }
   0x9   : > { %p852_p4 = por %p140_p2, %p139_p1  ;;  %s124_s26 = ssub.s32 %s777_s19, %s962_s23 }
   0xa   : > { %p585_p6 = scmp.ge.s32.totalorder %s781_s20, 1  ;;  %p127_p7 = scmp.eq.s32.totalorder %s124_s26, 0 }
   0xb   : > { %p859_p8 = por %p146_p5, %p145_p3  ;;  %p221_p9 = scmp.lt.s32.totalorder %s781_s20, 3 }
   0xc   : > { %s865_s28 = scalar_select %p127_p7, %s769_s17, %s129_s24  }
   0xd   : > { %p222_p10 = pnand %p585_p6, %p221_p9 }
   0xe   : > { %p268_p11 = scmp.lt.s32.totalorder (!%p222_p10), %s773_s18, 1  ;;  %v325_v0 = vld [vmem:[%s951_s2] sm:$0xff] (!%p222_p10)  ;;  %vm327_vm0 = vcmask (!%p222_p10), 523264   ;;  %v326_v29 = vld [vmem:[%s951_s2 + $0x8] sm:$0xff] (!%p222_p10)  ;;  %vm299_vm1 = vcmask (!%p222_p10), 7168   ;;  %v783_v30 = vmov (!%p222_p10), 0.0  }
   0xf   : > { %225 = sbr.rel (%p222_p10) target bundleno = 392 (0x188), region = 32  ;;  %626 = vmatprep.mubr.msk.f32.mxu0 (!%p222_p10), %vm327_vm0, %v325_v0  ;;  %300 = vst.msk [vmem:[#allocation2] sm:$0xff] (!%p222_p10), %vm299_vm1, %v783_v30  ;;  %s255_s21 = sand.u32 (!%p222_p10), 1, %s765_s16   ;;  %vm418_vm2 = vcmask (!%p222_p10), 64520  }
  0x10   : > { %s586_s22 = sshll.u32 (!%p222_p10), %s255_s21, 3  ;;  %s784_s24 = smov (!%p222_p10), 1  }
  0x11   : > { %s257_s26 = scalar_lea.vmem (!%p222_p10), [#allocation3], %s586_s22  ;;  %s785_s29 = smov (!%p222_p10), 121  }
  0x12   : > { %s595_s30 = sshll.u32 (!%p222_p10), %s773_s18, 7  ;;  %s786_s14 = smov (!%p222_p10), [#allocation3]  }
  0x13   : > { %s894_s10 = scalar_lea.hbm (!%p222_p10), %s952_s3, %s595_s30  ;;  %s707_s22 = sshll.u32 (!%p222_p10), %s786_s14, 4  ;;  %s708_s22 = int_to_ptr.vmem [resolvable:$false] %s707_s22 }
  0x16   : > { %s873_s5 = scalar_select %p268_p11, %s773_s18, 1  ;;  %v409_v31 = vld [vmem:[#allocation2] sm:$0xff] }
  0x17   : > { %s429_s18 = scalar_lea.sflag [#allocation4], %s255_s21 }
  0x18   : > { %s598_s6 = sshll.u32 %s873_s5, 6  ;;  %s591_s7 = sshll.u32 %s873_s5, 3 }
  0x19   : > { %s275_s9 = scalar_lea.vmem %s949_s0, %s598_s6  ;;  %s285_s12 = scalar_lea.vmem %s950_s1, %s598_s6 }
  0x1a   : > { %v301_v1 = vld [vmem:[%s275_s9] sm:$0xff]  ;;  %v302_v2 = vld [vmem:[%s275_s9 + $0x8] sm:$0xff]  ;;  %v303_v6 = vld [vmem:[%s275_s9 + $0x10] sm:$0xff]  ;;  %s451_s6 = sshll.u32 %s257_s26, 4  ;;  %s901_s13 = scalar_lea.vmem %s953_s4, %s591_s7  ;;  %s896_s6 = int_to_ptr.vmem [resolvable:$true] %s451_s6 }
  0x1b   : > { %v309_v3 = vld [vmem:[%s285_s12] sm:$0xff]  ;;  %v310_v4 = vld [vmem:[%s285_s12 + $0x8] sm:$0xff]  ;;  %v304_v7 = vld [vmem:[%s275_s9 + $0x18] sm:$0xff]  ;;  %s703_s5 = scalar_lea.vmem %s896_s6, 128  ;;  %p710_p1 = scmp.lt.s32.totalorder %s896_s6, %s708_s22 }
  0x1c   : > { %v317_v5 = vmul.f32 %v309_v3, %v301_v1  ;;  %v318_v8 = vmul.f32 %v310_v4, %v302_v2  ;;  %v311_v9 = vld [vmem:[%s285_s12 + $0x10] sm:$0xff]  ;;  %v312_v10 = vld [vmem:[%s285_s12 + $0x18] sm:$0xff]  ;;  %v305_v11 = vld [vmem:[%s275_s9 + $0x20] sm:$0xff]  ;;  %p704_p12 = scmp.ne.s32.totalorder %s896_s6, %s703_s5 }
  0x1d   : > { %v319_v12 = vmul.f32 %v311_v9, %v303_v6  ;;  %v320_v13 = vmul.f32 %v312_v10, %v304_v7  ;;  %v306_v14 = vld [vmem:[%s275_s9 + $0x28] sm:$0xff]  ;;  %v313_v15 = vld [vmem:[%s285_s12 + $0x20] sm:$0xff]  ;;  %v307_v20 = vld [vmem:[%s275_s9 + $0x30] sm:$0xff] }
  0x1e   : > { %v314_v16 = vld [vmem:[%s285_s12 + $0x28] sm:$0xff]  ;;  %v629_v17 = vpack.c.bf16 %v318_v8, %v317_v5  ;;  %v321_v18 = vmul.f32 %v313_v15, %v305_v11  ;;  %v308_v22 = vld [vmem:[%s275_s9 + $0x38] sm:$0xff]  ;;  %v315_v23 = vld [vmem:[%s285_s12 + $0x30] sm:$0xff]  ;;  %p705_p13 = pnand %p704_p12, %p852_p4 }
  0x1f   : > { %v322_v19 = vmul.f32 %v314_v16, %v306_v14  ;;  %v633_v21 = vpack.c.bf16 %v320_v13, %v319_v12  ;;  %v316_v24 = vld [vmem:[%s285_s12 + $0x38] sm:$0xff]  ;;  %v323_v26 = vmul.f32 %v315_v23, %v307_v20 }
  0x20   : > { %630 = vmatprep.subr.bf16.mxu0 %v629_v17  ;;  %v324_v27 = vmul.f32 %v316_v24, %v308_v22  ;;  %p706_p0 = pneg %p705_p13 }
  0x21   : > { %632 = vmatpush3.bf16.msra.mxu0 %v629_v17  ;;  %v637_v25 = vpack.c.bf16 %v322_v19, %v321_v18 }
  0x22   : > { %634 = vmatprep.subr.bf16.mxu0 %v633_v21  ;;  %v641_v28 = vpack.c.bf16 %v324_v27, %v323_v26 }
  0x25   : > { %636 = vmatpush3.bf16.msra.mxu0 %v633_v21 }
  0x26   : > { %638 = vmatprep.subr.bf16.mxu0 %v637_v25 }
  0x29   : > { %640 = vmatpush3.bf16.msra.mxu0 %v637_v25 }
  0x2a   : > { %642 = vmatprep.subr.bf16.mxu0 %v641_v28 }
  0x2d   : > { %644 = vmatpush3.bf16.msra.mxu0 %v641_v28 }
  0x30   : > { %627 = vmatmul.mubr.msk.f32.vlgmr.msra.gmra.mrb[0].mxu0 %vm327_vm0, %v326_v29 }
 0x103   : > { %v628_v32 = vpop.f32.mrb[0].mxu0 }
 0x104   : > { %414 = vrot.lane.b32.xlu0 %v628_v32, %s784_s24  ;;  %v400_v33 = vpop.f32.mrb[1].mxu0  ;;  %s709_s24 = scalar_lea.vmem %s708_s22, 256 }
 0x105   : > { %v410_v34 = vadd.f32 %v409_v31, %v400_v33  ;;  %p711_p2 = scmp.lt.s32.totalorder %s709_s24, %s703_s5 }
 0x107   : > { %412 = vst.msk [vmem:[%s257_s26] sm:$0xff] %vm299_vm1, %v410_v34  ;;  %p712_p3 = por %p711_p2, %p710_p1 }
 0x108   : > { %420 = vrot.lane.b32.xlu0 %v628_v32, %s785_s29 }
 0x109   : > { %p713_p5 = pnand %p712_p3, %p706_p0 }
 0x176   : > { %v415_v35 = vpop.permute.xlu0 %414 }
 0x177   : > { %v417_v36 = vadd.f32 %v415_v35, %v400_v33 }
 0x179   : > { %419 = vst.msk [vmem:[%s257_s26] sm:$0xff] %vm418_vm2, %v417_v36 }
 0x17a   : > { %v421_v37 = vpop.permute.xlu0 %420 }
 0x17b   : > { %716 = shalt.err (!%p713_p5)
}
 0x17c   : > { %s717_s21 = scalar_lea.hbm %s894_s10, 128  ;;  %s721_s30 = scalar_lea.hbm %s952_s3, 256 }
 0x17d   : > { %p718_p6 = scmp.ne.s32.totalorder %s894_s10, %s717_s21  ;;  %p722_p10 = scmp.lt.u32.totalorder %s894_s10, %s952_s3 }
 0x17e   : > { %p723_p11 = scmp.lt.u32.totalorder %s721_s30, %s717_s21  ;;  %p725_p13 = scmp.lt.u32.totalorder %s717_s21, %s894_s10 }
 0x17f   : > { %p719_p7 = pnand %p718_p6, %p852_p4 }
 0x180   : > { %p724_p12 = por %p723_p11, %p722_p10 }
 0x181   : > { %p720_p9 = pneg %p719_p7 }
 0x182   : > { %p726_p0 = por %p725_p13, %p724_p12 }
 0x184   : > { %p727_p1 = pnand %p726_p0, %p720_p9 }
 0x186   : > { %730 = shalt.err (!%p727_p1)
}
 0x187   : > { %645 = dma.vmem_to_hbm [thread:$0]  (%p852_p4), %s896_s6, 128, %s894_s10, %s429_s18   ;;  %423 = vst.msk [vmem:[#allocation2] sm:$0xff] %vm299_vm1, %v421_v37  ;;  %427 = vst.msk [vmem:[%s901_s13] sm:$0xff] %vm299_vm1, %v421_v37 }
 0x188 PF: > { %p651_p2 = scmp.ge.s32.totalorder %s781_s20, 2  ;;  %s466_s9 = sand.u32 1, %s761_s15  }
 0x189   : > { %s467_s11 = scalar_lea.sflag [#allocation4], %s466_s9 }
 0x18a   : > { %p648_p3 = pnand %p651_p2, %p859_p8 }
 0x18c   : > { %756 = dma.done.wait (!%p648_p3), %s467_s11, 128  }
 0x18d   : > { %758 = vsyncadd (!%p648_p3), %s467_s11, 4294967168  ;;  %s18_s20 = sadd.s32 1, %s781_s20   ;;  %s956_s15 = smov %s765_s16 }
 0x18e   : > { %p15_p5 = scmp.ge.s32.totalorder %s18_s20, 4   ;;  %s957_s16 = smov %s769_s17 }
 0x18f   : > { %s958_s17 = smov %s865_s28  ;;  %s959_s18 = smov %s777_s19 }
 0x190   : > { %s960_s19 = smov %s962_s23  ;;  %17 = sbr.rel (!%p15_p5) target bundleno = 4 (0x4), region = 90 }
 0x197   :  { %482 = vsyncpa [#allocation4], 1 }
 0x198   :  { %484 = vsyncpa [#allocation4 + $0x1], 1 }

</bundles_post_ra>
